<compile_context>
chip_gen: v7x
topology: tpu7x:2x2x1
jax: 0.10.0
libtpu: 0.0.40
codegen_flags: <defaults>
</compile_context>

<pallas_src>
import functools

import jax
import jax.numpy as jnp
from jax import lax
from jax.experimental import pallas as pl
from jax.experimental.pallas import tpu as pltpu

LANE = 128
_VMEM_BUDGET = 40 * 1024 * 1024  # conservative working-set budget (v7x physical VMEM = 64 MiB)
_TM_CANDIDATES = (512, 384, 256, 192, 128, 96, 64, 48, 32, 16)


def _round_up(x, m):
    return (x + m - 1) // m * m


def _pad_rows(a, rows):
    if a.shape[0] == rows:
        return a
    return jnp.pad(a, ((0, rows - a.shape[0]), (0, 0)))


def _pick_tm(M):
    """M tile: multiple of 16, prefer dividing M (no row-pad copy) and >= 2 tiles (v7x megacore)."""
    for tm in _TM_CANDIDATES:
        if M % tm == 0 and M // tm >= 2:
            return tm, M
    for tm in _TM_CANDIDATES:
        if M % tm == 0:
            return tm, M
    tm = min(256, _round_up(M, 16))
    return tm, _round_up(M, tm)


def _pick_tk(K_p, fixed_bytes, TM, Cout_p):
    """Largest K tile whose (double-buffered) working set fits the VMEM budget.

    TK == K_p keeps the weights resident in VMEM (DMA'd once instead of once per M tile)."""
    candidates = [K_p] + [c for c in (2048, 1024, 768, 512, 384, 256, 128)
                          if c < K_p and K_p % c == 0]
    for tk in candidates:
        ws = fixed_bytes + 2 * TM * tk * 2 + 2 * tk * Cout_p * 2
        if ws <= _VMEM_BUDGET:
            return tk, ws
    tk = candidates[-1]
    return tk, fixed_bytes + 2 * TM * tk * 2 + 2 * tk * Cout_p * 2


def _conv_bn_kernel(*refs, apply_relu, residual_mode, out_is_acc):
    if residual_mode == "matmul":
        p_ref, w_ref, b_ref, rp_ref, rw_ref = refs[:5]
        rest = refs[5:]
    elif residual_mode == "add":
        p_ref, w_ref, b_ref, r_ref = refs[:4]
        rest = refs[4:]
    else:
        p_ref, w_ref, b_ref = refs[:3]
        rest = refs[3:]

    if out_is_acc:                      # f32 output doubles as the accumulator (no scratch)
        (o_ref,) = rest
        acc_ref = o_ref
    else:
        o_ref, acc_ref = rest

    k = pl.program_id(1)

    @pl.when(k == 0)
    def _():
        if residual_mode == "matmul":
            # Fused 1x1-conv skip branch initializes the accumulator: runs once per M tile,
            # overlapped with the K pipeline instead of sitting in the epilogue critical path.
            acc_ref[...] = jnp.dot(rp_ref[...], rw_ref[...],
                                   preferred_element_type=jnp.float32)
        else:
            acc_ref[...] = jnp.zeros_like(acc_ref)

    acc_ref[...] += jnp.dot(p_ref[...], w_ref[...],
                            preferred_element_type=jnp.float32)

    @pl.when(k == pl.num_programs(1) - 1)
    def _():
        y = acc_ref[...] + b_ref[...]          # BN scale already folded into the weights
        if apply_relu:
            y = jnp.maximum(y, 0.0)
        if residual_mode == "add":
            y = y + r_ref[...].astype(jnp.float32)
        o_ref[...] = y.astype(o_ref.dtype)


def conv_bn_act(patches, w, scale, bias, *, apply_relu=False,
                residual=None, skip_patches=None, skip_w=None,
                skip_scale=None, skip_bias=None, out_dtype=jnp.float32):
    """Fused (patches @ (w*scale)) + bias [+ReLU] [+residual | +(skip @ (wd*sd)) + bd].

    patches: [M, K_p] bf16 (K already zero-padded to a multiple of 128 by _im2col);
    w: [K, Cout] f32; scale/bias: [Cout] f32; residual: [M, Cout] (identity skip) or None;
    skip_patches: [M, Ks_p] bf16; skip_w: [Ks, Cout]; skip_scale/skip_bias: [Cout].
    """
    M, K_p = patches.shape
    K, Cout = w.shape
    Cout_p = _round_up(Cout, LANE)
    out_itemsize = jnp.dtype(out_dtype).itemsize
    out_is_acc = jnp.dtype(out_dtype) == jnp.dtype(jnp.float32)

    TM, M_p = _pick_tm(M)
    n_m = M_p // TM

    # Fold BN scale into the weights in f32, then cast to bf16 (matches the MXU operand dtype).
    w_f = w.astype(jnp.float32) * scale.astype(jnp.float32)[None, :]
    w_p = jnp.pad(w_f, ((0, K_p - K), (0, Cout_p - Cout))).astype(jnp.bfloat16)

    b_total = bias.astype(jnp.float32)
    if skip_patches is not None:
        b_total = b_total + skip_bias.astype(jnp.float32)
    b_p = jnp.pad(b_total.reshape(1, Cout), ((0, 0), (0, Cout_p - Cout)))

    # VMEM working-set estimate (double-buffered pipelined blocks) -> TK selection.
    fixed = 2 * 1 * Cout_p * 4                     # bias buffers
    fixed += 2 * TM * Cout_p * out_itemsize        # output blocks
    if not out_is_acc:
        fixed += TM * Cout_p * 4                   # f32 accumulator scratch
    if skip_patches is not None:
        residual_mode = "matmul"
        Ks = skip_w.shape[0]
        Ks_p = skip_patches.shape[1]
        fixed += 2 * TM * Ks_p * 2 + 2 * Ks_p * Cout_p * 2
    elif residual is not None:
        residual_mode = "add"
        fixed += 2 * TM * Cout_p * 2
    else:
        residual_mode = "none"

    TK, ws = _pick_tk(K_p, fixed, TM, Cout_p)
    n_k = K_p // TK

    args = [_pad_rows(patches, M_p), w_p, b_p]
    in_specs = [
        pl.BlockSpec((TM, TK), lambda i, k: (i, k)),
        pl.BlockSpec((TK, Cout_p), lambda i, k: (k, 0)),
        pl.BlockSpec((1, Cout_p), lambda i, k: (0, 0)),
    ]

    flops = 2 * M_p * K_p * Cout_p
    w_fetches = 1 if TK == K_p else n_m
    bytes_accessed = (M_p * K_p * 2 + w_fetches * K_p * Cout_p * 2
                      + M_p * Cout_p * out_itemsize + Cout_p * 4)

    if residual_mode == "matmul":
        sk_f = skip_w.astype(jnp.float32) * skip_scale.astype(jnp.float32)[None, :]
        sk_p = jnp.pad(sk_f, ((0, Ks_p - Ks), (0, Cout_p - Cout))).astype(jnp.bfloat16)
        args += [_pad_rows(skip_patches, M_p), sk_p]
        in_specs += [
            pl.BlockSpec((TM, Ks_p), lambda i, k: (i, 0)),
            pl.BlockSpec((Ks_p, Cout_p), lambda i, k: (0, 0)),
        ]
        flops += 2 * M_p * Ks_p * Cout_p
        bytes_accessed += M_p * Ks_p * 2 + Ks_p * Cout_p * 2
    elif residual_mode == "add":
        r = jnp.pad(residual.astype(jnp.bfloat16),
                    ((0, M_p - M), (0, Cout_p - Cout)))
        args.append(r)
        in_specs.append(pl.BlockSpec((TM, Cout_p), lambda i, k: (i, 0)))
        bytes_accessed += M_p * Cout_p * 2

    kernel = functools.partial(_conv_bn_kernel, apply_relu=apply_relu,
                               residual_mode=residual_mode, out_is_acc=out_is_acc)
    scratch_shapes = [] if out_is_acc else [pltpu.VMEM((TM, Cout_p), jnp.float32)]
    vmem_limit = int(min(max(2 * ws, 32 << 20), 56 << 20))

    out = pl.pallas_call(
        kernel,
        out_shape=jax.ShapeDtypeStruct((M_p, Cout_p), out_dtype),
        grid_spec=pltpu.PrefetchScalarGridSpec(
            num_scalar_prefetch=0,
            grid=(n_m, n_k),
            in_specs=in_specs,
            out_specs=pl.BlockSpec((TM, Cout_p), lambda i, k: (i, 0)),
            scratch_shapes=scratch_shapes,
        ),
        compiler_params=pltpu.CompilerParams(
            dimension_semantics=("parallel", "arbitrary"),
            vmem_limit_bytes=vmem_limit),
        cost_estimate=pl.CostEstimate(flops=int(flops), transcendentals=0,
                                      bytes_accessed=int(bytes_accessed)),
    )(*args)

    if M_p == M and Cout_p == Cout:
        return out
    return out[:M, :Cout]


def _im2col(x_nhwc, ksize, stride, dtype=jnp.bfloat16):
    """[N,H,W,C] -> ([N*Hout*Wout, round_up(k*k*C,128)] dtype, (N,Hout,Wout)); padding = ksize//2.

    The K (lane) padding to a multiple of 128 is folded into the concatenate (a zeros column
    block), so the patch matrix never needs a second full-HBM padding pass."""
    N, H, W, C = x_nhwc.shape
    pad = ksize // 2
    Hout = (H + 2 * pad - ksize) // stride + 1
    Wout = (W + 2 * pad - ksize) // stride + 1
    xp = x_nhwc.astype(dtype)
    if pad:
        xp = jnp.pad(xp, ((0, 0), (pad, pad), (pad, pad), (0, 0)))
    cols = []
    for kh in range(ksize):
        for kw in range(ksize):
            cols.append(xp[:, kh:kh + stride * Hout:stride,
                            kw:kw + stride * Wout:stride, :])
    K = ksize * ksize * C
    K_p = _round_up(K, LANE)
    if K_p > K:
        cols.append(jnp.zeros((N, Hout, Wout, K_p - K), dtype))
    patches = jnp.concatenate(cols, axis=-1)  # column order (kh, kw, cin) [+ zero pad]
    return patches.reshape(N * Hout * Wout, K_p), (N, Hout, Wout)


def _fold_bn(gamma, beta, mean, var, conv_bias=None, eps=1e-5):
    s = gamma / jnp.sqrt(var + eps)
    cb = 0.0 if conv_bias is None else conv_bias
    b = beta + s * (cb - mean)
    return s, b


def init_resnet_block_params(key, in_features, out_features, first_stride):
    ks = jax.random.split(key, 8)

    def bn_init(k):
        k1, k2, k3, k4 = jax.random.split(k, 4)
        gamma = jax.random.uniform(k1, (out_features,), jnp.float32, 0.5, 1.5)
        beta = 0.1 * jax.random.normal(k2, (out_features,), jnp.float32)
        mean = 0.1 * jax.random.normal(k3, (out_features,), jnp.float32)
        var = jax.random.uniform(k4, (out_features,), jnp.float32, 0.5, 1.5)
        return gamma, beta, mean, var

    p = {
        "w1": 0.2 * jax.random.normal(ks[0], (3, 3, in_features, out_features), jnp.float32),
        "bn1": bn_init(ks[1]),
        "w2": 0.2 * jax.random.normal(ks[2], (3, 3, out_features, out_features), jnp.float32),
        "bn2": bn_init(ks[3]),
    }
    if first_stride != 1 or out_features != in_features:
        p["wd"] = 0.2 * jax.random.normal(ks[4], (1, 1, in_features, out_features), jnp.float32)
        p["bd"] = 0.1 * jax.random.normal(ks[5], (out_features,), jnp.float32)
        p["bnd"] = bn_init(ks[6])
    return p


def resnet_block_forward(params, x_nchw, first_stride):
    """x_nchw: [N, Cin, H, W] float32 -> [N, Cout, Hout, Wout] float32."""
    x = jnp.transpose(x_nchw, (0, 2, 3, 1)).astype(jnp.float32)  # NCHW -> NHWC
    Cin = x.shape[-1]
    Cout = params["w1"].shape[-1]

    s1, b1 = _fold_bn(*params["bn1"])
    s2, b2 = _fold_bn(*params["bn2"])

    # conv3x3(stride) + BN + ReLU  (bf16 intermediate)
    patches1, (N, Hout, Wout) = _im2col(x, 3, first_stride)
    y1 = conv_bn_act(patches1, params["w1"].reshape(9 * Cin, Cout), s1, b1,
                     apply_relu=True, out_dtype=jnp.bfloat16)
    y1_nhwc = y1.reshape(N, Hout, Wout, Cout)

    # conv3x3(1) + BN, fused with skip branch (1x1 conv + BN, or identity) + add
    patches2, _ = _im2col(y1_nhwc, 3, 1)
    if "wd" in params:
        sd, bd = _fold_bn(*params["bnd"], conv_bias=params["bd"])
        skip_patches, _ = _im2col(x, 1, first_stride)
        y = conv_bn_act(patches2, params["w2"].reshape(9 * Cout, Cout), s2, b2,
                        skip_patches=skip_patches,
                        skip_w=params["wd"].reshape(Cin, Cout),
                        skip_scale=sd, skip_bias=bd, out_dtype=jnp.float32)
    else:
        residual = x.reshape(N * Hout * Wout, Cout)
        y = conv_bn_act(patches2, params["w2"].reshape(9 * Cout, Cout), s2, b2,
                        residual=residual, out_dtype=jnp.float32)

    out_nhwc = y.reshape(N, Hout, Wout, Cout)
    return jnp.transpose(out_nhwc, (0, 3, 1, 2))  # NHWC -> NCHW


def _reference_forward(params, x_nchw, first_stride, compute_dtype=jnp.float32):
    """Pure-JAX (lax.conv) reference. compute_dtype=bf16 emulates the kernel's operand casts
    (including the BN scale folded into the weights before the bf16 cast)."""
    dn = ("NHWC", "HWIO", "NHWC")

    def conv(a, w, stride, padding):
        a = a.astype(compute_dtype).astype(jnp.float32)
        w = w.astype(compute_dtype).astype(jnp.float32)
        return lax.conv_general_dilated(a, w, (stride, stride), padding,
                                        dimension_numbers=dn,
                                        precision=lax.Precision.HIGHEST,
                                        preferred_element_type=jnp.float32)

    x = jnp.transpose(x_nchw, (0, 2, 3, 1)).astype(jnp.float32)
    s1, b1 = _fold_bn(*params["bn1"])
    s2, b2 = _fold_bn(*params["bn2"])
    y = conv(x, params["w1"] * s1, first_stride, [(1, 1), (1, 1)])
    y = jnp.maximum(y + b1, 0.0)
    y = y.astype(compute_dtype).astype(jnp.float32)  # kernel stores y1 in bf16
    y = conv(y, params["w2"] * s2, 1, [(1, 1), (1, 1)]) + b2
    if "wd" in params:
        sd, bd = _fold_bn(*params["bnd"], conv_bias=params["bd"])
        xa = conv(x, params["wd"] * sd, first_stride, [(0, 0), (0, 0)]) + bd
    else:
        xa = x.astype(compute_dtype).astype(jnp.float32)  # kernel streams residual as bf16
    return jnp.transpose(xa + y, (0, 3, 1, 2))


if __name__ == "__main__":
    key = jax.random.PRNGKey(0)
    kx1, kp1, kx2, kp2 = jax.random.split(key, 4)

    # Case 1: downsample skip (Cin=4 -> Cout=8, stride 2)
    x1 = jax.random.normal(kx1, (2, 4, 16, 16), jnp.float32)
    p1 = init_resnet_block_params(kp1, 4, 8, 2)
    out1 = jax.block_until_ready(resnet_block_forward(p1, x1, 2))
    assert out1.shape == (2, 8, 8, 8), out1.shape
    ref1 = jax.block_until_ready(_reference_forward(p1, x1, 2, jnp.bfloat16))
    assert jnp.allclose(out1, ref1, atol=2e-3, rtol=2e-3), \
        float(jnp.max(jnp.abs(out1 - ref1)))
    ref1_f32 = jax.block_until_ready(_reference_forward(p1, x1, 2, jnp.float32))
    assert jnp.allclose(out1, ref1_f32, atol=1e-1, rtol=1e-1), \
        float(jnp.max(jnp.abs(out1 - ref1_f32)))

    # Case 2: identity skip (Cin=Cout=8, stride 1)
    x2 = jax.random.normal(kx2, (2, 8, 16, 16), jnp.float32)
    p2 = init_resnet_block_params(kp2, 8, 8, 1)
    out2 = jax.block_until_ready(resnet_block_forward(p2, x2, 1))
    assert out2.shape == (2, 8, 16, 16), out2.shape
    ref2 = jax.block_until_ready(_reference_forward(p2, x2, 1, jnp.bfloat16))
    assert jnp.allclose(out2, ref2, atol=2e-3, rtol=2e-3), \
        float(jnp.max(jnp.abs(out2 - ref2)))

    print("KERNEL_OK")
</pallas_src>

<mosaic_0001>
module attributes {stable_mosaic.version = 11 : i64} {
  func.func @_conv_bn_kernel(%arg0: i32, %arg1: i32, %arg2: memref<64x128xbf16, #tpu.memory_space<vmem>>, %arg3: memref<128x128xbf16, #tpu.memory_space<vmem>>, %arg4: memref<1x128xf32, #tpu.memory_space<vmem>>, %arg5: memref<64x128xbf16, #tpu.memory_space<vmem>>, %arg6: memref<64x128xf32, #tpu.memory_space<vmem>>) attributes {dimension_semantics = [#tpu.dimension_semantics<parallel>, #tpu.dimension_semantics<arbitrary>], iteration_bounds = array<i64: 2, 1>, scalar_prefetch = 0 : i64, scratch_operands = 1 : i64, tpu.core_type = #tpu.core_type<tc>, window_params = [{transform_indices = @transform_0, window_bounds = array<i64: 64, 128>}, {transform_indices = @transform_1, window_bounds = array<i64: 128, 128>}, {pipeline_mode = #tpu.pipeline_mode<synchronous>, transform_indices = @transform_2, window_bounds = array<i64: 1, 128>}, {transform_indices = @transform_3, window_bounds = array<i64: 64, 128>}]} {
    %c0_i32 = arith.constant 0 : i32
    %0 = arith.cmpi eq, %arg1, %c0_i32 : i32
    %1 = arith.extui %0 : i1 to i32
    %c0_i32_0 = arith.constant 0 : i32
    %2 = arith.cmpi ne, %1, %c0_i32_0 : i32
    scf.if %2 {
      %cst_10 = arith.constant 0.000000e+00 : f32
      %12 = vector.broadcast %cst_10 : f32 to vector<64x128xf32>
      %c0_11 = arith.constant 0 : index
      %c0_12 = arith.constant 0 : index
      %13 = vector.load %arg6[%c0_11, %c0_12] : memref<64x128xf32, #tpu.memory_space<vmem>>, vector<64x128xf32>
      tpu.vector_store %arg6[%c0_11, %c0_12], %12 {strides = array<i32>} : memref<64x128xf32, #tpu.memory_space<vmem>>, vector<64x128xf32>,
    } else {
    }
    %c0 = arith.constant 0 : index
    %c0_1 = arith.constant 0 : index
    %3 = vector.load %arg6[%c0, %c0_1] : memref<64x128xf32, #tpu.memory_space<vmem>>, vector<64x128xf32>
    %c0_2 = arith.constant 0 : index
    %c0_3 = arith.constant 0 : index
    %4 = vector.load %arg2[%c0_2, %c0_3] : memref<64x128xbf16, #tpu.memory_space<vmem>>, vector<64x128xbf16>
    %c0_4 = arith.constant 0 : index
    %c0_5 = arith.constant 0 : index
    %5 = vector.load %arg3[%c0_4, %c0_5] : memref<128x128xbf16, #tpu.memory_space<vmem>>, vector<128x128xbf16>
    %cst = arith.constant dense<0.000000e+00> : vector<64x128xf32>
    %6 = tpu.matmul %4, %5, %cst {dimension_numbers = #tpu.dot_dimension_numbers<[1], [0], [0], [1], [0, 0, 1, 1], [], []>} : vector<64x128xbf16>, vector<128x128xbf16>, vector<64x128xf32> -> vector<64x128xf32>
    %7 = arith.addf %3, %6 : vector<64x128xf32>
    %c0_6 = arith.constant 0 : index
    %c0_7 = arith.constant 0 : index
    %8 = vector.load %arg6[%c0_6, %c0_7] : memref<64x128xf32, #tpu.memory_space<vmem>>, vector<64x128xf32>
    tpu.vector_store %arg6[%c0_6, %c0_7], %7 {strides = array<i32>} : memref<64x128xf32, #tpu.memory_space<vmem>>, vector<64x128xf32>,
    %c0_i32_8 = arith.constant 0 : i32
    %9 = arith.cmpi eq, %arg1, %c0_i32_8 : i32
    %10 = arith.extui %9 : i1 to i32
    %c0_i32_9 = arith.constant 0 : i32
    %11 = arith.cmpi ne, %10, %c0_i32_9 : i32
    scf.if %11 {
      %c0_10 = arith.constant 0 : index
      %c0_11 = arith.constant 0 : index
      %12 = vector.load %arg6[%c0_10, %c0_11] : memref<64x128xf32, #tpu.memory_space<vmem>>, vector<64x128xf32>
      %c0_12 = arith.constant 0 : index
      %c0_13 = arith.constant 0 : index
      %13 = vector.load %arg4[%c0_12, %c0_13] : memref<1x128xf32, #tpu.memory_space<vmem>>, vector<1x128xf32>
      %14 = vector.broadcast %13 : vector<1x128xf32> to vector<64x128xf32>
      %15 = arith.addf %12, %14 : vector<64x128xf32>
      %cst_14 = arith.constant 0.000000e+00 : f32
      %16 = vector.broadcast %cst_14 : f32 to vector<64x128xf32>
      %17 = arith.maximumf %15, %16 : vector<64x128xf32>
      %18 = arith.truncf %17 : vector<64x128xf32> to vector<64x128xbf16>
      %c0_15 = arith.constant 0 : index
      %c0_16 = arith.constant 0 : index
      %19 = vector.load %arg5[%c0_15, %c0_16] : memref<64x128xbf16, #tpu.memory_space<vmem>>, vector<64x128xbf16>
      tpu.vector_store %arg5[%c0_15, %c0_16], %18 {strides = array<i32>} : memref<64x128xbf16, #tpu.memory_space<vmem>>, vector<64x128xbf16>,
    } else {
    }
    return
  }
  func.func @transform_0(%arg0: i32, %arg1: i32) -> (i32, i32) {
    %c0_i32 = arith.constant 0 : i32
    return %arg0, %arg1 : i32, i32
  }
  func.func @transform_1(%arg0: i32, %arg1: i32) -> (i32, i32) {
    %c0_i32 = arith.constant 0 : i32
    %c0_i32_0 = arith.constant 0 : i32
    return %arg1, %c0_i32 : i32, i32
  }
  func.func @transform_2(%arg0: i32, %arg1: i32) -> (i32, i32) {
    %c0_i32 = arith.constant 0 : i32
    %c0_i32_0 = arith.constant 0 : i32
    %c0_i32_1 = arith.constant 0 : i32
    return %c0_i32, %c0_i32_0 : i32, i32
  }
  func.func @transform_3(%arg0: i32, %arg1: i32) -> (i32, i32) {
    %c0_i32 = arith.constant 0 : i32
    %c0_i32_0 = arith.constant 0 : i32
    return %arg0, %c0_i32 : i32, i32
  }
}

</mosaic_0001>

<bundles_post_ra>
// kernel: tpu_custom_call.1
= control target key start
LH: loop header
LB: loop body
LE: loop exit
PB: predicated region body
PF: predicated region fallthrough
CT: control target
= control target key end

     0   :  { %8 = vsyncpa [#allocation4], 0  ;;  %s1234_s0 = inlined_call_operand.hbm [shape: bf16[128,128], index: 0, kind: input, shape index: {}]   ;;  %s1235_s1 = inlined_call_operand.hbm [shape: bf16[128,128], index: 1, kind: input, shape index: {}]   ;;  %s1236_s2 = inlined_call_operand.vmem [shape: f32[1,128], index: 2, kind: input, shape index: {}]   ;;  %s1237_s3 = inlined_call_operand.hbm [shape: bf16[128,128], index: 3, kind: output, shape index: {}]  }
   0x1   :  { %10 = vsyncpa [#allocation4 + $0x1], 0 }
   0x2   :  { %11 = vsyncpa [#allocation7], 0 }
   0x3   :  { %12 = vsyncpa [#allocation5], 0 }
   0x4   :  { %14 = vsyncpa [#allocation5 + $0x1], 0  ;;  %s996_s12 = smov 0   ;;  %s998_s13 = smov 0  }
   0x5   :  { %s1000_s14 = smov 0   ;;  %s1002_s15 = smov 0  }
   0x6   :  { %s1004_s16 = smov 0   ;;  %s1006_s17 = smov 0  }
   0x7 LB: > { %s611_s18 = sadd.s32 4294967295, %s967_s17   ;;  %s612_s19 = sadd.s32 4294967294, %s967_s17   ;;  %s967_s17 = sphi %s1006_s17, %s20_s17   ;;  %s963_s16 = sphi %s1004_s16, %s1261_s16   ;;  %s959_s15 = sphi %s1002_s15, %s1260_s15   ;;  %s955_s14 = sphi %s1000_s14, %s1259_s14   ;;  %s951_s13 = sphi %s998_s13, %s1258_s13   ;;  %s947_s12 = sphi %s996_s12, %s1257_s12  }
   0x8   : > { %p54_p0 = scmp.ne.s32.totalorder %s951_s13, %s947_s12  ;;  %p1030_p1 = scmp.eq.s32.totalorder %s611_s18, 0 }
   0x9   : > { %p1034_p2 = scmp.eq.s32.totalorder %s611_s18, 1  ;;  %p131_p3 = scmp.eq.s32.totalorder %s612_s19, 1 }
   0xa   : > { %s1242_s20 = scalar_select %p1030_p1, 1, 0 }
   0xb   : > { %s1243_s21 = scalar_select %p1034_p2, 1, 0 }
   0xc   : > { %p1040_p4 = por %p1030_p1, %p54_p0  ;;  %p613_p5 = scmp.ge.s32.totalorder %s967_s17, 1 }
   0xd   : > { %p1045_p6 = por %p131_p3, %p54_p0  ;;  %p138_p7 = scmp.lt.s32.totalorder %s967_s17, 3 }
   0xe   : > { %s1244_s22 = scalar_select %p1040_p4, 1, 0 }
   0xf   : > { %s1245_s23 = scalar_select %p1045_p6, 1, 0 }
  0x10   : > { %p1050_p8 = pnand %p613_p5, %p138_p7  ;;  %s969_s25 = smov [#allocation6]  }
  0x11   : > { %s153_s26 = sshll.u32 %s969_s25, 4  ;;  %s32_s28 = sadd.s32 1, %s963_s16  ;;  %s154_s26 = int_to_ptr.vmem [resolvable:$true] %s153_s26 }
  0x12   : > { %s1246_s24 = scalar_select %p1050_p8, 1, 0 }
  0x13   : > { %p742_p9 = pneg %p1050_p8  ;;  %s823_s4 = scalar_lea.hbm %s1235_s1, 1024 }
  0x14   : > { %p824_p12 = scmp.ne.s32.totalorder %s1235_s1, %s823_s4  ;;  %p830_p5 = scmp.lt.u32.totalorder %s823_s4, %s1235_s1 }
  0x15   : > { %p1059_p11 = pnand %p742_p9, %p1030_p1 }
  0x17   : > { %p825_p13 = pneg %p1059_p11 }
  0x19   : > { %p826_p0 = pnand %p825_p13, %p824_p12 }
  0x1b   : > { %p827_p3 = pneg %p826_p0 }
  0x1d   : > { %p832_p7 = pnand %p830_p5, %p827_p3 }
  0x1f   : > { %835 = shalt.err (!%p832_p7)
}
  0x20   : > { %s836_s9 = scalar_lea.vmem %s154_s26, 1024  ;;  %p844_p1 = scmp.lt.s32.totalorder %s154_s26, %s154_s26 }
  0x21   : > { %p837_p9 = scmp.ne.s32.totalorder %s154_s26, %s836_s9  ;;  %p845_p4 = scmp.lt.s32.totalorder %s836_s9, %s836_s9 }
  0x23   : > { %p839_p10 = pnand %p837_p9, %p825_p13  ;;  %p846_p8 = por %p845_p4, %p844_p1 }
  0x25   : > { %p840_p6 = pneg %p839_p10 }
  0x27   : > { %p847_p2 = pnand %p846_p8, %p840_p6 }
  0x29   : > { %850 = shalt.err (!%p847_p2)
}
  0x2a   : > { %s970_s10 = smov 64   ;;  %s971_s11 = smov 4  }
  0x2b   : > { %745 = dma.hbm_to_vmem [thread:$0]  (!%p1059_p11), %s1235_s1, 1024, %s154_s26, [#allocation7], %s970_s10, %s970_s10, %s971_s11  }
  0x2c   : > { %p34_p1 = scmp.ge.s32.totalorder %s32_s28, 2  ;;  %s41_s25 = sadd.s32 1, %s955_s14 }
  0x2d   : > { %p48_p2 = scmp.ne.s32.totalorder %s955_s14, %s951_s13  ;;  %p49_p4 = scmp.eq.s32.totalorder %s967_s17, 0 }
  0x2e   : > { %s1263_s28 = smov (%p34_p1, %s32_s28), 0  ;;  %p1249_p8 = scmp.ne.s32.totalorder %s1243_s21, 0 }
  0x2f   : > { %p1089_p6 = por %p49_p4, %p48_p2  ;;  %s36_s30 = ssub.s32 %s963_s16, %s1263_s28 }
  0x30   : > { %p1095_p10 = por %p1249_p8, %p48_p2  ;;  %p755_p12 = scmp.lt.s32.totalorder %s967_s17, 2 }
  0x31   : > { %p39_p11 = scmp.eq.s32.totalorder %s36_s30, 0  ;;  %s170_s26 = sand.u32 1, %s955_s14  }
  0x32   : > { %s616_s4 = sshll.u32 %s170_s26, 5  ;;  %s649_s6 = sshll.u32 %s963_s16, 9 }
  0x33   : > { %s1104_s5 = scalar_select %p39_p11, %s955_s14, %s41_s25  }
  0x34   : > { %s1110_s9 = scalar_lea.hbm %s1234_s0, %s649_s6  ;;  %s174_s21 = scalar_lea.vmem [#allocation3], %s616_s4 }
  0x35   : > { %s182_s18 = sshll.u32 %s174_s21, 4  ;;  %p1116_p13 = pnand %p755_p12, %p1089_p6  ;;  %s1112_s18 = int_to_ptr.vmem [resolvable:$true] %s182_s18 }
  0x36   : > { %s1120_s25 = scalar_lea.sflag [#allocation4], %s170_s26  ;;  %s851_s30 = scalar_lea.hbm %s1110_s9, 512 }
  0x37   : > { %p852_p0 = scmp.ne.s32.totalorder %s1110_s9, %s851_s30  ;;  %p853_p3 = pneg %p1116_p13 }
  0x38   : > { %s856_s29 = scalar_lea.hbm %s1234_s0, 1024  ;;  %p857_p9 = scmp.lt.u32.totalorder %s1110_s9, %s1234_s0 }
  0x39   : > { %p854_p5 = pnand %p853_p3, %p852_p0  ;;  %p858_p1 = scmp.lt.u32.totalorder %s856_s29, %s851_s30 }
  0x3a   : > { %p860_p4 = scmp.lt.u32.totalorder %s851_s30, %s1110_s9 }
  0x3b   : > { %p855_p7 = pneg %p854_p5  ;;  %p859_p2 = por %p858_p1, %p857_p9 }
  0x3d   : > { %p861_p6 = por %p860_p4, %p859_p2 }
  0x3f   : > { %p862_p8 = pnand %p861_p6, %p855_p7 }
  0x41   : > { %865 = shalt.err (!%p862_p8)
}
  0x42   : > { %s866_s26 = scalar_lea.vmem %s1112_s18, 512  ;;  %s972_s21 = smov [#allocation3]  }
  0x43   : > { %p867_p12 = scmp.ne.s32.totalorder %s1112_s18, %s866_s26  ;;  %s871_s4 = sshll.u32 %s972_s21, 4  ;;  %s872_s4 = int_to_ptr.vmem [resolvable:$false] %s871_s4 }
  0x44   : > { %s873_s6 = scalar_lea.vmem %s872_s4, 1024  ;;  %p874_p5 = scmp.lt.s32.totalorder %s1112_s18, %s872_s4 }
  0x45   : > { %p869_p11 = pnand %p867_p12, %p853_p3  ;;  %p875_p9 = scmp.lt.s32.totalorder %s873_s6, %s866_s26 }
  0x47   : > { %p870_p0 = pneg %p869_p11  ;;  %p876_p1 = por %p875_p9, %p874_p5 }
  0x49   : > { %p877_p2 = pnand %p876_p1, %p870_p0 }
  0x4b   : > { %880 = shalt.err (!%p877_p2)
}
  0x4c   : > { %749 = dma.hbm_to_vmem [thread:$0]  (!%p1116_p13), %s1110_s9, 512, %s1112_s18, %s1120_s25, %s970_s10, %s970_s10, %s971_s11  }
  0x4d   : > { %p1252_p3 = scmp.ne.s32.totalorder %s1246_s24, 0 }
  0x4e   : > { %s1154_s30 = sand.u32 (!%p1252_p3), 1, %s951_s13   ;;  %p1253_p7 = scmp.ne.s32.totalorder (!%p1252_p3), %s1244_s22, 0 }
  0x4f   : > { %194 = sbr.rel (%p1252_p3) target bundleno = 359 (0x167), region = 32  ;;  %s620_s29 = sshll.u32 (!%p1252_p3), %s1154_s30, 5 }
  0x50   : > { %s197_s7 = scalar_lea.sflag (!%p1252_p3), [#allocation4], %s1154_s30  ;;  %s1160_s19 = scalar_lea.vmem (!%p1252_p3), [#allocation3], %s620_s29 }
  0x56   : > { %934 = dma.done.wait (%p1253_p7), %s197_s7, 512  }
  0x57   : > { %936 = vsyncadd (%p1253_p7), %s197_s7, 4294966784  ;;  %p1254_p13 = scmp.ne.s32.totalorder %s1242_s20, 0 }
  0x59   : > { %938 = dma.done.wait (%p1254_p13), [#allocation7], 1024  }
  0x5a   : > { %940 = vsyncadd (%p1254_p13), [#allocation7], 4294966272  ;;  %v811_v0 = vld [vmem:[#allocation6] sm:$0xff]   ;;  %v812_v1 = vld [vmem:[#allocation6 + $0x8] sm:$0xff]   ;;  %s226_s24 = scalar_lea.vmem [#allocation8], %s620_s29  ;;  %s658_s11 = sshll.u32 %s959_s15, 9 }
  0x5b   : > { %694 = vmatprep.subr.bf16.mxu0 %v811_v0  ;;  %718 = vmatprep.subr.bf16.mxu1 %v811_v0  ;;  %v813_v2 = vld [vmem:[#allocation6 + $0x10] sm:$0xff]   ;;  %v814_v3 = vld [vmem:[#allocation6 + $0x18] sm:$0xff]   ;;  %v819_v4 = vld [vmem:[%s1160_s19] sm:$0xff]   ;;  %s516_s10 = sshll.u32 %s226_s24, 4  ;;  %s1185_s15 = scalar_lea.hbm %s1237_s3, %s658_s11  ;;  %s1180_s10 = int_to_ptr.vmem [resolvable:$true] %s516_s10 }
  0x5c   : > { %695 = vmatpush3.bf16.msra.mxu0 %v811_v0  ;;  %726 = vmatpush3.bf16.msra.mxu1 %v811_v0  ;;  %v820_v5 = vld [vmem:[%s1160_s19 + $0x10] sm:$0xff]   ;;  %v815_v6 = vld [vmem:[#allocation6 + $0x20] sm:$0xff]   ;;  %v816_v7 = vld [vmem:[#allocation6 + $0x28] sm:$0xff]   ;;  %s503_s25 = scalar_lea.sflag [#allocation5], %s1154_s30  ;;  %s881_s8 = scalar_lea.vmem %s1180_s10, 512 }
  0x5d   : > { %696 = vmatprep.subr.bf16.mxu0 %v812_v1  ;;  %719 = vmatprep.subr.bf16.mxu1 %v812_v1  ;;  %v817_v8 = vld [vmem:[#allocation6 + $0x30] sm:$0xff]   ;;  %v818_v9 = vld [vmem:[#allocation6 + $0x38] sm:$0xff]   ;;  %v821_v10 = vld [vmem:[%s1160_s19 + $0x8] sm:$0xff]   ;;  %p882_p4 = scmp.ne.s32.totalorder %s1180_s10, %s881_s8  ;;  %s973_s26 = smov [#allocation8]  }
  0x5e   : > { %710 = vmatprep.mubr.bf16.mxu0 %v819_v4  ;;  %714 = vmatprep.mubr.bf16.mxu1 %v820_v5  ;;  %v822_v11 = vld [vmem:[%s1160_s19 + $0x18] sm:$0xff]   ;;  %v635_v12 = vld [vmem:[%s1236_s2] ss:$0 sm:$0xff]  ;;  %s885_s21 = sshll.u32 %s973_s26, 4  ;;  %s886_s21 = int_to_ptr.vmem [resolvable:$false] %s885_s21 }
  0x5f   : > { %p883_p6 = pnand %p882_p4, %p1095_p10  ;;  %s887_s4 = scalar_lea.vmem %s886_s21, 1024 }
  0x60   : > { %697 = vmatpush3.bf16.msra.mxu0 %v812_v1  ;;  %727 = vmatpush3.bf16.msra.mxu1 %v812_v1  ;;  %p888_p12 = scmp.lt.s32.totalorder %s1180_s10, %s886_s21  ;;  %p889_p11 = scmp.lt.s32.totalorder %s887_s4, %s881_s8 }
  0x61   : > { %698 = vmatprep.subr.bf16.mxu0 %v813_v2  ;;  %720 = vmatprep.subr.bf16.mxu1 %v813_v2  ;;  %p884_p8 = pneg %p883_p6 }
  0x62   : > { %p890_p0 = por %p889_p11, %p888_p12 }
  0x64   : > { %699 = vmatpush3.bf16.msra.mxu0 %v813_v2  ;;  %728 = vmatpush3.bf16.msra.mxu1 %v813_v2  ;;  %p891_p5 = pnand %p890_p0, %p884_p8 }
  0x65   : > { %700 = vmatprep.subr.bf16.mxu0 %v814_v3  ;;  %721 = vmatprep.subr.bf16.mxu1 %v814_v3 }
  0x68   : > { %701 = vmatpush3.bf16.msra.mxu0 %v814_v3  ;;  %729 = vmatpush3.bf16.msra.mxu1 %v814_v3 }
  0x69   : > { %702 = vmatprep.subr.bf16.mxu0 %v815_v6  ;;  %722 = vmatprep.subr.bf16.mxu1 %v815_v6 }
  0x6c   : > { %703 = vmatpush3.bf16.msra.mxu0 %v815_v6  ;;  %730 = vmatpush3.bf16.msra.mxu1 %v815_v6 }
  0x6d   : > { %704 = vmatprep.subr.bf16.mxu0 %v816_v7  ;;  %723 = vmatprep.subr.bf16.mxu1 %v816_v7 }
  0x70   : > { %705 = vmatpush3.bf16.msra.mxu0 %v816_v7  ;;  %731 = vmatpush3.bf16.msra.mxu1 %v816_v7 }
  0x71   : > { %706 = vmatprep.subr.bf16.mxu0 %v817_v8  ;;  %724 = vmatprep.subr.bf16.mxu1 %v817_v8 }
  0x74   : > { %707 = vmatpush3.bf16.msra.mxu0 %v817_v8  ;;  %732 = vmatpush3.bf16.msra.mxu1 %v817_v8 }
  0x75   : > { %708 = vmatprep.subr.bf16.mxu0 %v818_v9  ;;  %725 = vmatprep.subr.bf16.mxu1 %v818_v9 }
  0x78   : > { %709 = vmatpush3.bf16.msra.mxu0 %v818_v9  ;;  %733 = vmatpush3.bf16.msra.mxu1 %v818_v9 }
  0x7b   : > { %711 = vmatmul.mubr.bf16.vlgmr.msra.gmra.mrb[0].mxu0 %v821_v10  ;;  %715 = vmatmul.mubr.bf16.vlgmr.msra.gmra.mrb[0].mxu1 %v822_v11 }
 0x14e   : > { %v712_v13 = vpop.f32.mrb[0].mxu0  ;;  %v716_v14 = vpop.f32.mrb[0].mxu1 }
 0x14f   : > { %v448_v15 = vadd.f32 %v712_v13, %v635_v12  ;;  %v452_v16 = vadd.f32 %v716_v14, %v635_v12  ;;  %v381_v17 = vpop.f32.mrb[1].mxu0  ;;  %v397_v18 = vpop.f32.mrb[1].mxu1 }
 0x150   : > { %v446_v19 = vadd.f32 %v635_v12, %v381_v17  ;;  %v450_v20 = vadd.f32 %v635_v12, %v397_v18  ;;  %v713_v21 = vpop.f32.mrb[2].mxu0  ;;  %v717_v22 = vpop.f32.mrb[2].mxu1 }
 0x151   : > { %v449_v23 = vadd.f32 %v713_v21, %v635_v12  ;;  %v453_v24 = vadd.f32 %v717_v22, %v635_v12  ;;  %v384_v25 = vpop.f32.mrb[3].mxu0  ;;  %v400_v26 = vpop.f32.mrb[3].mxu1  ;;  %v456_v29 = vmax.f32 %v448_v15, 0.0  ;;  %v460_v30 = vmax.f32 %v452_v16, 0.0 }
 0x152   : > { %v447_v27 = vadd.f32 %v635_v12, %v384_v25  ;;  %v451_v28 = vadd.f32 %v635_v12, %v400_v26  ;;  %v454_v33 = vmax.f32 %v446_v19, 0.0  ;;  %v458_v34 = vmax.f32 %v450_v20, 0.0 }
 0x153   : > { %v457_v31 = vmax.f32 %v449_v23, 0.0  ;;  %v461_v32 = vmax.f32 %v453_v24, 0.0 }
 0x154   : > { %v455_v35 = vmax.f32 %v447_v27, 0.0  ;;  %v459_v36 = vmax.f32 %v451_v28, 0.0 }
 0x155   : > { %v667_v37 = vpack.c.bf16 %v457_v31, %v456_v29  ;;  %v677_v38 = vpack.c.bf16 %v461_v32, %v460_v30 }
 0x156   : > { %v662_v39 = vpack.c.bf16 %v455_v35, %v454_v33  ;;  %v672_v40 = vpack.c.bf16 %v459_v36, %v458_v34 }
 0x157   : > { %679 = vst [vmem:[%s226_s24 + $0x8] sm:$0xff] %v667_v37   ;;  %681 = vst [vmem:[%s226_s24 + $0x18] sm:$0xff] %v677_v38  }
 0x158   : > { %663 = vst [vmem:[%s226_s24] sm:$0xff] %v662_v39   ;;  %680 = vst [vmem:[%s226_s24 + $0x10] sm:$0xff] %v672_v40  }
 0x159   : > { %894 = shalt.err (!%p891_p5)
}
 0x15a   : > { %s895_s6 = scalar_lea.hbm %s1185_s15, 512  ;;  %s899_s19 = scalar_lea.hbm %s1237_s3, 1024 }
 0x15b   : > { %p896_p9 = scmp.ne.s32.totalorder %s1185_s15, %s895_s6  ;;  %p900_p3 = scmp.lt.u32.totalorder %s1185_s15, %s1237_s3 }
 0x15c   : > { %p901_p7 = scmp.lt.u32.totalorder %s899_s19, %s895_s6  ;;  %p903_p4 = scmp.lt.u32.totalorder %s895_s6, %s1185_s15 }
 0x15d   : > { %p897_p1 = pnand %p896_p9, %p1095_p10 }
 0x15e   : > { %p902_p13 = por %p901_p7, %p900_p3 }
 0x15f   : > { %p898_p2 = pneg %p897_p1 }
 0x160   : > { %p904_p6 = por %p903_p4, %p902_p13 }
 0x162   : > { %p905_p8 = pnand %p904_p6, %p898_p2 }
 0x164   : > { %908 = shalt.err (!%p905_p8)
}
 0x165   : > { %s974_s24 = smov 64   ;;  %s975_s11 = smov 4  }
 0x166   : > { %740 = dma.vmem_to_hbm [thread:$0]  (%p1095_p10), %s1180_s10, 512, %s1185_s15, %s503_s25, %s974_s24, %s974_s24, %s975_s11  }
 0x167 PF: > { %s531_s9 = sand.u32 1, %s947_s12   ;;  %p1255_p12 = scmp.ne.s32.totalorder %s1245_s23, 0 }
 0x168   : > { %p1256_p11 = scmp.ge.s32.totalorder %s967_s17, 2  ;;  %s532_s18 = scalar_lea.sflag [#allocation5], %s531_s9 }
 0x16a   : > { %p751_p0 = pnand %p1256_p11, %p1255_p12 }
 0x16c   : > { %942 = dma.done.wait (!%p751_p0), %s532_s18, 512  }
 0x16d   : > { %944 = vsyncadd (!%p751_p0), %s532_s18, 4294966784  ;;  %s20_s17 = sadd.s32 1, %s967_s17   ;;  %s1257_s12 = smov %s951_s13 }
 0x16e   : > { %p17_p5 = scmp.ge.s32.totalorder %s20_s17, 4   ;;  %s1258_s13 = smov %s955_s14 }
 0x16f   : > { %s1259_s14 = smov %s1104_s5  ;;  %s1260_s15 = smov %s963_s16 }
 0x170   : > { %s1261_s16 = smov %s1263_s28  ;;  %19 = sbr.rel (!%p17_p5) target bundleno = 7 (0x7), region = 90 }
 0x177   :  { %537 = vsyncpa [#allocation4], 1 }
 0x178   :  { %539 = vsyncpa [#allocation4 + $0x1], 1 }
 0x179   :  { %540 = vsyncpa [#allocation7], 1 }
 0x17a   :  { %541 = vsyncpa [#allocation5], 1 }
 0x17b   :  { %543 = vsyncpa [#allocation5 + $0x1], 1 }

</bundles_post_ra>
